<compile_context>
chip_gen: v7x
topology: tpu7x:2x2x1
jax: 0.10.0
libtpu: 0.0.40
codegen_flags: <defaults>
</compile_context>

<pallas_src>
import functools

import jax
import jax.numpy as jnp
from jax.experimental import pallas as pl
from jax.experimental.pallas import tpu as pltpu

LANE = 128
_VMEM_LIMIT = 32 * 1024 * 1024        # explicit scoped-VMEM budget (safe on v5e/v6e/v7x)
_VMEM_TILE_BUDGET = 24 * 1024 * 1024  # headroom for Mosaic internals


# ---------------------------------------------------------------------------
# helpers
# ---------------------------------------------------------------------------
def _round_up(v, m):
    return ((v + m - 1) // m) * m


def _choose_tile(padded, preferred):
    """Largest multiple of 128 that divides `padded` (padded % 128 == 0) and <= preferred."""
    t = max(min(preferred, padded), LANE)
    t -= t % LANE
    while t > LANE and padded % t:
        t -= LANE
    return t


def _pad2(a, rows, cols):
    return jnp.pad(a, ((0, rows - a.shape[0]), (0, cols - a.shape[1])))


# ---------------------------------------------------------------------------
# Kernel 1: feature projection  H = D^{-1/2} (X @ W)   (bf16 output)
# ---------------------------------------------------------------------------
def _project_kernel(x_ref, w_ref, d_ref, o_ref):
    xw = jnp.dot(x_ref[...], w_ref[...], preferred_element_type=jnp.float32)
    o_ref[...] = (d_ref[...] * xw).astype(o_ref.dtype)


def _project(x, w, d_col):
    """x:[Np,Fin] bf16, w:[Fin,Fout] bf16, d_col:[Np,1] f32 -> [Np,Fout] bf16."""
    n_p, f_in = x.shape
    f_out = w.shape[1]
    tm = _choose_tile(n_p, 512)
    grid = (n_p // tm,)

    flops = int(2 * n_p * f_in * f_out)
    bytes_accessed = int(
        x.size * x.dtype.itemsize
        + w.size * w.dtype.itemsize
        + d_col.size * d_col.dtype.itemsize
        + n_p * f_out * 2
    )

    return pl.pallas_call(
        _project_kernel,
        out_shape=jax.ShapeDtypeStruct((n_p, f_out), jnp.bfloat16),
        grid_spec=pltpu.PrefetchScalarGridSpec(
            num_scalar_prefetch=0,
            grid=grid,
            in_specs=[
                pl.BlockSpec((tm, f_in), lambda i: (i, 0)),     # X row tile
                pl.BlockSpec((f_in, f_out), lambda i: (0, 0)),  # full W (resident)
                pl.BlockSpec((tm, 1), lambda i: (i, 0)),        # D^{-1/2} rows
            ],
            out_specs=pl.BlockSpec((tm, f_out), lambda i: (i, 0)),
        ),
        compiler_params=pltpu.CompilerParams(
            dimension_semantics=("parallel",),
            vmem_limit_bytes=_VMEM_LIMIT,
        ),
        cost_estimate=pl.CostEstimate(
            flops=flops, transcendentals=0, bytes_accessed=bytes_accessed
        ),
    )(x, w, d_col)


# ---------------------------------------------------------------------------
# Kernel 2: aggregation  out = [relu]( D^{-1/2} (A_hat @ H) + b )
# grid = (N/tm, N/tk); reduction axis k is last; feature dim kept whole so the
# A matrix streams exactly once per layer.
# ---------------------------------------------------------------------------
def _aggregate_kernel(a_ref, h_ref, d_ref, b_ref, o_ref, acc_ref, *, apply_relu):
    k = pl.program_id(1)

    @pl.when(k == 0)
    def _():
        acc_ref[...] = jnp.zeros_like(acc_ref)

    acc_ref[...] += jnp.dot(
        a_ref[...], h_ref[...], preferred_element_type=jnp.float32
    )

    @pl.when(k == pl.num_programs(1) - 1)
    def _():
        r = d_ref[...] * acc_ref[...] + b_ref[...]   # row-scale + bias in f32
        if apply_relu:
            r = jnp.maximum(r, 0.0)
        o_ref[...] = r.astype(o_ref.dtype)


def _aggregate(a, h, d_col, b_row, *, apply_relu, out_dtype):
    """a:[Np,Np] 0/1 bf16, h:[Np,Fout] bf16, d_col:[Np,1] f32, b_row:[1,Fout] f32."""
    n_p = a.shape[0]
    f_out = h.shape[1]

    tm = _choose_tile(n_p, 512)
    if n_p >= 2 * LANE and tm > n_p // 2:   # v7x: keep grid[0] >= 2 (2 TensorCores)
        tm = _choose_tile(n_p, n_p // 2)
    tk = _choose_tile(n_p, 2048)

    def _footprint(tm_, tk_):
        a_b = tm_ * tk_ * a.dtype.itemsize * 2            # double-buffered A tile
        h_b = tk_ * f_out * h.dtype.itemsize * 2
        o_b = tm_ * f_out * jnp.dtype(out_dtype).itemsize * 2
        acc_b = tm_ * f_out * 4
        d_b = tm_ * 4 * 2 + f_out * 4 * 2
        return a_b + h_b + o_b + acc_b + d_b

    while tk > LANE and _footprint(tm, tk) > _VMEM_TILE_BUDGET:
        tk = _choose_tile(n_p, tk - LANE)
    while tm > LANE and _footprint(tm, tk) > _VMEM_TILE_BUDGET:
        tm = _choose_tile(n_p, tm - LANE)

    grid = (n_p // tm, n_p // tk)

    flops = int(2 * n_p * n_p * f_out)
    bytes_accessed = int(
        a.size * a.dtype.itemsize                    # A streamed exactly once
        + h.size * h.dtype.itemsize * grid[0]        # H re-streamed per row tile
        + d_col.size * d_col.dtype.itemsize
        + b_row.size * b_row.dtype.itemsize
        + n_p * f_out * jnp.dtype(out_dtype).itemsize
    )

    kernel = functools.partial(_aggregate_kernel, apply_relu=apply_relu)

    return pl.pallas_call(
        kernel,
        out_shape=jax.ShapeDtypeStruct((n_p, f_out), out_dtype),
        grid_spec=pltpu.PrefetchScalarGridSpec(
            num_scalar_prefetch=0,
            grid=grid,
            in_specs=[
                pl.BlockSpec((tm, tk), lambda i, k: (i, k)),       # A tile
                pl.BlockSpec((tk, f_out), lambda i, k: (k, 0)),    # H k-slab
                pl.BlockSpec((tm, 1), lambda i, k: (i, 0)),        # D^{-1/2} rows
                pl.BlockSpec((1, f_out), lambda i, k: (0, 0)),     # bias
            ],
            out_specs=pl.BlockSpec((tm, f_out), lambda i, k: (i, 0)),
            scratch_shapes=[pltpu.VMEM((tm, f_out), jnp.float32)],
        ),
        compiler_params=pltpu.CompilerParams(
            dimension_semantics=("parallel", "arbitrary"),
            vmem_limit_bytes=_VMEM_LIMIT,
        ),
        cost_estimate=pl.CostEstimate(
            flops=flops, transcendentals=0, bytes_accessed=bytes_accessed
        ),
    )(a, h, d_col, b_row)


# ---------------------------------------------------------------------------
# Graph glue (XLA): A_hat as exact 0/1 bf16 + D^{-1/2} as an f32 vector.
# ---------------------------------------------------------------------------
def build_adjacency(edge_index, num_nodes):
    src, dst = edge_index[0], edge_index[1]
    a = jnp.zeros((num_nodes, num_nodes), jnp.bfloat16)
    # message flows src -> dst (row = dst, col = src); .set de-duplicates edges
    a = a.at[dst, src].set(1.0)
    diag = jnp.arange(num_nodes)
    a = a.at[diag, diag].set(1.0)                 # self loops (idempotent)
    deg = jnp.sum(a, axis=1, dtype=jnp.float32)
    d_inv_sqrt = jnp.where(deg > 0, jax.lax.rsqrt(deg), 0.0)
    return a, d_inv_sqrt


def gcn_encoder(x, edge_index, w1, b1, w2, b2):
    n, c_in = x.shape
    hidden = w1.shape[1]

    a_hat, d_inv_sqrt = build_adjacency(edge_index, n)

    n_p = _round_up(n, LANE)
    cin_p = _round_up(c_in, LANE)
    h_p = _round_up(hidden, LANE)

    a_p = _pad2(a_hat, n_p, n_p)                                   # exact 0/1 bf16
    d_p = jnp.pad(d_inv_sqrt, (0, n_p - n)).reshape(n_p, 1)        # f32 column
    x_p = _pad2(x, n_p, cin_p).astype(jnp.bfloat16)
    w1_p = _pad2(w1, cin_p, h_p).astype(jnp.bfloat16)
    w2_p = _pad2(w2, h_p, h_p).astype(jnp.bfloat16)
    b1_p = jnp.pad(b1, (0, h_p - hidden)).reshape(1, h_p).astype(jnp.float32)
    b2_p = jnp.pad(b2, (0, h_p - hidden)).reshape(1, h_p).astype(jnp.float32)

    # Layer 1: relu(D^-1/2 A_hat D^-1/2 X W1 + b1), bf16 for the next MXU feed.
    h1s = _project(x_p, w1_p, d_p)
    h1 = _aggregate(a_p, h1s, d_p, b1_p, apply_relu=True, out_dtype=jnp.bfloat16)
    # Layer 2: D^-1/2 A_hat D^-1/2 h1 W2 + b2, final output in f32.
    h2s = _project(h1, w2_p, d_p)
    out = _aggregate(a_p, h2s, d_p, b2_p, apply_relu=False, out_dtype=jnp.float32)
    return out[:n, :hidden]


def glorot(key, shape):
    fan_in, fan_out = shape
    limit = (6.0 / (fan_in + fan_out)) ** 0.5
    return jax.random.uniform(key, shape, jnp.float32, -limit, limit)


if __name__ == "__main__":
    N, C_IN, HIDDEN = 8, 4, 32

    key = jax.random.PRNGKey(0)
    k_x, k_w1, k_w2 = jax.random.split(key, 3)

    x = jax.random.normal(k_x, (N, C_IN), jnp.float32)

    # small undirected ring graph on N nodes (both directions listed)
    src = jnp.arange(N, dtype=jnp.int32)
    dst = (src + 1) % N
    edge_index = jnp.stack(
        [jnp.concatenate([src, dst]), jnp.concatenate([dst, src])], axis=0
    )  # [2, 2N]

    # GCNConv params: weight [in, out] (glorot), bias [out] (zeros)
    w1 = glorot(k_w1, (C_IN, HIDDEN))
    b1 = jnp.zeros((HIDDEN,), jnp.float32)
    w2 = glorot(k_w2, (HIDDEN, HIDDEN))
    b2 = jnp.zeros((HIDDEN,), jnp.float32)

    out = gcn_encoder(x, edge_index, w1, b1, w2, b2)
    jax.block_until_ready(out)
    assert out.shape == (N, HIDDEN)

    # Reference with matching precision (bf16 MXU operands, f32 accumulate/scale).
    a_bf, dinv = build_adjacency(edge_index, N)
    dcol = dinv[:, None]
    h1s_ref = (dcol * jnp.dot(x.astype(jnp.bfloat16), w1.astype(jnp.bfloat16),
                              preferred_element_type=jnp.float32)).astype(jnp.bfloat16)
    agg1 = jnp.dot(a_bf, h1s_ref, preferred_element_type=jnp.float32)
    h1_ref = jnp.maximum(dcol * agg1 + b1, 0.0).astype(jnp.bfloat16)
    h2s_ref = (dcol * jnp.dot(h1_ref, w2.astype(jnp.bfloat16),
                              preferred_element_type=jnp.float32)).astype(jnp.bfloat16)
    agg2 = jnp.dot(a_bf, h2s_ref, preferred_element_type=jnp.float32)
    ref = dcol * agg2 + b2

    assert jnp.allclose(out, ref, atol=2e-2, rtol=2e-2), "mismatch vs reference"

    print("KERNEL_OK")
</pallas_src>

<mosaic_0001>
module attributes {stable_mosaic.version = 11 : i64} {
  func.func @_project_kernel(%arg0: i32, %arg1: memref<128x128xbf16, #tpu.memory_space<vmem>>, %arg2: memref<128x128xbf16, #tpu.memory_space<vmem>>, %arg3: memref<128x1xf32, #tpu.memory_space<vmem>>, %arg4: memref<128x128xbf16, #tpu.memory_space<vmem>>) attributes {dimension_semantics = [#tpu.dimension_semantics<parallel>], iteration_bounds = array<i64: 1>, scalar_prefetch = 0 : i64, scratch_operands = 0 : i64, tpu.core_type = #tpu.core_type<tc>, window_params = [{transform_indices = @transform_0, window_bounds = array<i64: 128, 128>}, {pipeline_mode = #tpu.pipeline_mode<synchronous>, transform_indices = @transform_1, window_bounds = array<i64: 128, 128>}, {transform_indices = @transform_2, window_bounds = array<i64: 128, 1>}, {transform_indices = @transform_3, window_bounds = array<i64: 128, 128>}]} {
    %c0 = arith.constant 0 : index
    %c0_0 = arith.constant 0 : index
    %0 = vector.load %arg1[%c0, %c0_0] : memref<128x128xbf16, #tpu.memory_space<vmem>>, vector<128x128xbf16>
    %c0_1 = arith.constant 0 : index
    %c0_2 = arith.constant 0 : index
    %1 = vector.load %arg2[%c0_1, %c0_2] : memref<128x128xbf16, #tpu.memory_space<vmem>>, vector<128x128xbf16>
    %cst = arith.constant dense<0.000000e+00> : vector<128x128xf32>
    %2 = tpu.matmul %0, %1, %cst {dimension_numbers = #tpu.dot_dimension_numbers<[1], [0], [0], [1], [0, 0, 1, 1], [], []>} : vector<128x128xbf16>, vector<128x128xbf16>, vector<128x128xf32> -> vector<128x128xf32>
    %c0_3 = arith.constant 0 : index
    %c0_4 = arith.constant 0 : index
    %3 = vector.load %arg3[%c0_3, %c0_4] : memref<128x1xf32, #tpu.memory_space<vmem>>, vector<128x1xf32>
    %4 = vector.broadcast %3 : vector<128x1xf32> to vector<128x128xf32>
    %5 = arith.mulf %4, %2 : vector<128x128xf32>
    %6 = arith.truncf %5 : vector<128x128xf32> to vector<128x128xbf16>
    %c0_5 = arith.constant 0 : index
    %c0_6 = arith.constant 0 : index
    %7 = vector.load %arg4[%c0_5, %c0_6] : memref<128x128xbf16, #tpu.memory_space<vmem>>, vector<128x128xbf16>
    tpu.vector_store %arg4[%c0_5, %c0_6], %6 {strides = array<i32>} : memref<128x128xbf16, #tpu.memory_space<vmem>>, vector<128x128xbf16>,
    return
  }
  func.func @transform_0(%arg0: i32) -> (i32, i32) {
    %c0_i32 = arith.constant 0 : i32
    %c0_i32_0 = arith.constant 0 : i32
    return %arg0, %c0_i32 : i32, i32
  }
  func.func @transform_1(%arg0: i32) -> (i32, i32) {
    %c0_i32 = arith.constant 0 : i32
    %c0_i32_0 = arith.constant 0 : i32
    %c0_i32_1 = arith.constant 0 : i32
    return %c0_i32, %c0_i32_0 : i32, i32
  }
  func.func @transform_2(%arg0: i32) -> (i32, i32) {
    %c0_i32 = arith.constant 0 : i32
    %c0_i32_0 = arith.constant 0 : i32
    return %arg0, %c0_i32 : i32, i32
  }
  func.func @transform_3(%arg0: i32) -> (i32, i32) {
    %c0_i32 = arith.constant 0 : i32
    %c0_i32_0 = arith.constant 0 : i32
    return %arg0, %c0_i32 : i32, i32
  }
}

</mosaic_0001>

<bundles_post_ra>
// kernel: tpu_custom_call.1
= control target key start
LH: loop header
LB: loop body
LE: loop exit
PB: predicated region body
PF: predicated region fallthrough
CT: control target
= control target key end

     0   :  { %v654_v2 = vmov 0   ;;  %s786_s0 = inlined_call_operand.vmem [shape: bf16[128,128], index: 0, kind: input, shape index: {}]   ;;  %s787_s1 = inlined_call_operand.vmem [shape: bf16[128,128], index: 1, kind: input, shape index: {}]   ;;  %s788_s2 = inlined_call_operand.vmem [shape: f32[128,1], index: 2, kind: input, shape index: {}]   ;;  %s789_s3 = inlined_call_operand.hbm [shape: bf16[128,128], index: 3, kind: output, shape index: {}]  }
   0x1   :  { %v614_v0 = vld [vmem:[%s787_s1] sm:$0xff]   ;;  %v615_v1 = vld [vmem:[%s787_s1 + $0x8] sm:$0xff]   ;;  %613 = vset.pattern.permute.xlu1 %v654_v2  ;;  %612 = vset.pattern.permute.xlu0 %v654_v2  ;;  %v616_v3 = vld [vmem:[%s787_s1 + $0x10] sm:$0xff]  }
   0x2   :  { %560 = vmatprep.subr.bf16.mxu0 %v614_v0  ;;  %592 = vmatprep.subr.bf16.mxu1 %v614_v0  ;;  %v617_v4 = vld [vmem:[%s787_s1 + $0x18] sm:$0xff]   ;;  %v622_v5 = vld [vmem:[%s786_s0] sm:$0xff]   ;;  %v619_v8 = vld [vmem:[%s787_s1 + $0x28] sm:$0xff]  }
   0x3   :  { %561 = vmatpush3.bf16.msra.mxu0 %v614_v0  ;;  %600 = vmatpush3.bf16.msra.mxu1 %v614_v0  ;;  %v623_v6 = vld [vmem:[%s786_s0 + $0x20] sm:$0xff]   ;;  %v243_v9 = vld [vmem:[%s788_s2 + $0x10] sm:$0xff]  ;;  %v244_v11 = vld [vmem:[%s788_s2 + $0x18] sm:$0xff] }
   0x4   :  { %562 = vmatprep.subr.bf16.mxu0 %v615_v1  ;;  %593 = vmatprep.subr.bf16.mxu1 %v615_v1  ;;  %v618_v7 = vld [vmem:[%s787_s1 + $0x20] sm:$0xff]   ;;  %v242_v12 = vld [vmem:[%s788_s2 + $0x8] sm:$0xff]  ;;  %v620_v13 = vld [vmem:[%s787_s1 + $0x30] sm:$0xff]  }
   0x5   :  { %576 = vmatprep.mubr.bf16.mxu0 %v622_v5  ;;  %584 = vmatprep.mubr.bf16.mxu1 %v623_v6  ;;  %v241_v10 = vld [vmem:[%s788_s2] sm:$0xff] }
   0x6   :  { %269 = vperm.xlu1 %613, %v243_v9   ;;  %259 = vperm.xlu0 %612, %v241_v10  }
   0x7   :  { %563 = vmatpush3.bf16.msra.mxu0 %v615_v1  ;;  %601 = vmatpush3.bf16.msra.mxu1 %v615_v1 }
   0x8   :  { %564 = vmatprep.subr.bf16.mxu0 %v616_v3  ;;  %594 = vmatprep.subr.bf16.mxu1 %v616_v3 }
   0xa   :  { %274 = vperm.xlu1 %613, %v244_v11   ;;  %264 = vperm.xlu0 %612, %v242_v12  }
   0xb   :  { %565 = vmatpush3.bf16.msra.mxu0 %v616_v3  ;;  %602 = vmatpush3.bf16.msra.mxu1 %v616_v3 }
   0xc   :  { %566 = vmatprep.subr.bf16.mxu0 %v617_v4  ;;  %595 = vmatprep.subr.bf16.mxu1 %v617_v4 }
   0xf   :  { %567 = vmatpush3.bf16.msra.mxu0 %v617_v4  ;;  %603 = vmatpush3.bf16.msra.mxu1 %v617_v4 }
  0x10   :  { %568 = vmatprep.subr.bf16.mxu0 %v618_v7  ;;  %596 = vmatprep.subr.bf16.mxu1 %v618_v7 }
  0x13   :  { %569 = vmatpush3.bf16.msra.mxu0 %v618_v7  ;;  %604 = vmatpush3.bf16.msra.mxu1 %v618_v7 }
  0x14   :  { %570 = vmatprep.subr.bf16.mxu0 %v619_v8  ;;  %597 = vmatprep.subr.bf16.mxu1 %v619_v8 }
  0x15   :  { %8 = vsyncpa [#allocation3], 0  ;;  %v246_v14 = vld [vmem:[%s788_s2 + $0x28] sm:$0xff]  ;;  %v245_v15 = vld [vmem:[%s788_s2 + $0x20] sm:$0xff] }
  0x16   :  { %v621_v16 = vld [vmem:[%s787_s1 + $0x38] sm:$0xff]   ;;  %284 = vperm.xlu1 %613, %v246_v14   ;;  %279 = vperm.xlu0 %612, %v245_v15   ;;  %v247_v18 = vld [vmem:[%s788_s2 + $0x30] sm:$0xff]  ;;  %v624_v19 = vld [vmem:[%s786_s0 + $0x8] sm:$0xff]  }
  0x17   :  { %571 = vmatpush3.bf16.msra.mxu0 %v619_v8  ;;  %605 = vmatpush3.bf16.msra.mxu1 %v619_v8  ;;  %v248_v17 = vld [vmem:[%s788_s2 + $0x38] sm:$0xff]  ;;  %v625_v20 = vld [vmem:[%s786_s0 + $0x28] sm:$0xff]   ;;  %v249_v22 = vld [vmem:[%s788_s2 + $0x40] sm:$0xff] }
  0x18   :  { %572 = vmatprep.subr.bf16.mxu0 %v620_v13  ;;  %598 = vmatprep.subr.bf16.mxu1 %v620_v13  ;;  %v250_v21 = vld [vmem:[%s788_s2 + $0x48] sm:$0xff]  ;;  %v626_v23 = vld [vmem:[%s786_s0 + $0x10] sm:$0xff]   ;;  %v252_v25 = vld [vmem:[%s788_s2 + $0x58] sm:$0xff] }
  0x19   :  { %v627_v24 = vld [vmem:[%s786_s0 + $0x30] sm:$0xff]   ;;  %v628_v27 = vld [vmem:[%s786_s0 + $0x18] sm:$0xff]   ;;  %v254_v29 = vld [vmem:[%s788_s2 + $0x68] sm:$0xff] }
  0x1a   :  { %294 = vperm.xlu1 %613, %v248_v17   ;;  %289 = vperm.xlu0 %612, %v247_v18   ;;  %v251_v26 = vld [vmem:[%s788_s2 + $0x50] sm:$0xff]  ;;  %v629_v28 = vld [vmem:[%s786_s0 + $0x38] sm:$0xff]   ;;  %v253_v30 = vld [vmem:[%s788_s2 + $0x60] sm:$0xff]  ;;  %s655_s0 = smov [#allocation2]  }
  0x1b   :  { %573 = vmatpush3.bf16.msra.mxu0 %v620_v13  ;;  %606 = vmatpush3.bf16.msra.mxu1 %v620_v13  ;;  %v256_v31 = vld [vmem:[%s788_s2 + $0x78] sm:$0xff]  ;;  %v255_v32 = vld [vmem:[%s788_s2 + $0x70] sm:$0xff]  ;;  %s438_s2 = sshll.u32 %s655_s0, 4  ;;  %s439_s2 = int_to_ptr.vmem [resolvable:$true] %s438_s2 }
  0x1c   :  { %574 = vmatprep.subr.bf16.mxu0 %v621_v16  ;;  %599 = vmatprep.subr.bf16.mxu1 %v621_v16  ;;  %s630_s21 = scalar_lea.vmem %s439_s2, 1024  ;;  %p635_p1 = scmp.lt.s32.totalorder %s439_s2, %s439_s2 }
  0x1d   :  { %p631_p0 = scmp.ne.s32.totalorder %s439_s2, %s630_s21  ;;  %p636_p2 = scmp.lt.s32.totalorder %s630_s21, %s630_s21 }
  0x1e   :  { %304 = vperm.xlu1 %613, %v250_v21   ;;  %299 = vperm.xlu0 %612, %v249_v22  }
  0x1f   :  { %575 = vmatpush3.bf16.msra.mxu0 %v621_v16  ;;  %607 = vmatpush3.bf16.msra.mxu1 %v621_v16  ;;  %p637_p3 = por %p636_p2, %p635_p1 }
  0x21   :  { %p638_p4 = pnand %p637_p3, %p631_p0 }
  0x22   :  { %577 = vmatmul.mubr.bf16.vlgmr.msra.gmra.mrb[0].mxu0 %v624_v19  ;;  %585 = vmatmul.mubr.bf16.vlgmr.msra.gmra.mrb[0].mxu1 %v625_v20 }
  0x23   :  { %580 = vmatprep.mubr.bf16.mxu0 %v626_v23  ;;  %588 = vmatprep.mubr.bf16.mxu1 %v627_v24 }
  0x24   :  { %314 = vperm.xlu1 %613, %v252_v25   ;;  %309 = vperm.xlu0 %612, %v251_v26  }
  0x28   :  { %324 = vperm.xlu1 %613, %v254_v29   ;;  %319 = vperm.xlu0 %612, %v253_v30  }
  0x2a   :  { %581 = vmatmul.mubr.bf16.gmra.mrb[4].mxu0 %v628_v27  ;;  %589 = vmatmul.mubr.bf16.gmra.mrb[4].mxu1 %v629_v28 }
  0x2c   :  { %334 = vperm.xlu1 %613, %v256_v31   ;;  %329 = vperm.xlu0 %612, %v255_v32  }
  0x85   :  { %v270_v33 = vpop.permute.xlu1 %269  ;;  %v260_v34 = vpop.permute.xlu0 %259 }
  0x89   :  { %v275_v35 = vpop.permute.xlu1 %274  ;;  %v265_v36 = vpop.permute.xlu0 %264 }
  0x95   :  { %v285_v37 = vpop.permute.xlu1 %284  ;;  %v280_v38 = vpop.permute.xlu0 %279 }
  0x99   :  { %v295_v39 = vpop.permute.xlu1 %294  ;;  %v290_v40 = vpop.permute.xlu0 %289 }
  0x9d   :  { %v305_v41 = vpop.permute.xlu1 %304  ;;  %v300_v42 = vpop.permute.xlu0 %299 }
  0xa3   :  { %v315_v43 = vpop.permute.xlu1 %314  ;;  %v310_v44 = vpop.permute.xlu0 %309 }
  0xa7   :  { %v325_v45 = vpop.permute.xlu1 %324  ;;  %v320_v46 = vpop.permute.xlu0 %319 }
  0xab   :  { %v335_v3 = vpop.permute.xlu1 %334  ;;  %v330_v4 = vpop.permute.xlu0 %329 }
  0xf5   :  { %v578_v47 = vpop.f32.mrb[0].mxu0  ;;  %v586_v48 = vpop.f32.mrb[0].mxu1 }
  0xf6   :  { %v178_v49 = vpop.f32.mrb[1].mxu0  ;;  %v210_v50 = vpop.f32.mrb[1].mxu1  ;;  %v339_v53 = vmul.f32 %v578_v47, %v270_v33  ;;  %v347_v54 = vmul.f32 %v586_v48, %v310_v44 }
  0xf7   :  { %v579_v51 = vpop.f32.mrb[2].mxu0  ;;  %v587_v52 = vpop.f32.mrb[2].mxu1  ;;  %v337_v59 = vmul.f32 %v260_v34, %v178_v49  ;;  %v345_v60 = vmul.f32 %v300_v42, %v210_v50 }
  0xf8   :  { %v340_v55 = vmul.f32 %v579_v51, %v275_v35  ;;  %v348_v56 = vmul.f32 %v587_v52, %v315_v43  ;;  %v181_v57 = vpop.f32.mrb[3].mxu0  ;;  %v213_v58 = vpop.f32.mrb[3].mxu1 }
  0xf9   :  { %v338_v61 = vmul.f32 %v265_v36, %v181_v57  ;;  %v346_v62 = vmul.f32 %v305_v41, %v213_v58 }
  0xfa   :  { %v505_v63 = vpack.c.bf16 %v340_v55, %v339_v53  ;;  %v525_v0 = vpack.c.bf16 %v348_v56, %v347_v54 }
  0xfb   :  { %v500_v1 = vpack.c.bf16 %v338_v61, %v337_v59  ;;  %v520_v2 = vpack.c.bf16 %v346_v62, %v345_v60 }
  0xfc   :  { %537 = vst [vmem:[#allocation2 + $0x8] sm:$0xff] %v505_v63   ;;  %541 = vst [vmem:[#allocation2 + $0x28] sm:$0xff] %v525_v0  }
  0xfd   :  { %501 = vst [vmem:[#allocation2] sm:$0xff] %v500_v1   ;;  %540 = vst [vmem:[#allocation2 + $0x20] sm:$0xff] %v520_v2   ;;  %v582_v5 = vpop.f32.mrb[4].mxu0  ;;  %v590_v6 = vpop.f32.mrb[4].mxu1 }
  0xfe   :  { %v194_v7 = vpop.f32.mrb[5].mxu0  ;;  %v226_v8 = vpop.f32.mrb[5].mxu1  ;;  %v343_v11 = vmul.f32 %v582_v5, %v290_v40  ;;  %v351_v12 = vmul.f32 %v590_v6, %v330_v4 }
  0xff   :  { %v583_v9 = vpop.f32.mrb[6].mxu0  ;;  %v591_v10 = vpop.f32.mrb[6].mxu1  ;;  %v341_v17 = vmul.f32 %v280_v38, %v194_v7  ;;  %v349_v18 = vmul.f32 %v320_v46, %v226_v8 }
 0x100   :  { %v344_v13 = vmul.f32 %v583_v9, %v295_v39  ;;  %v352_v14 = vmul.f32 %v591_v10, %v335_v3  ;;  %v197_v15 = vpop.f32.mrb[7].mxu0  ;;  %v229_v16 = vpop.f32.mrb[7].mxu1 }
 0x101   :  { %v342_v19 = vmul.f32 %v285_v37, %v197_v15  ;;  %v350_v20 = vmul.f32 %v325_v45, %v229_v16 }
 0x102   :  { %v515_v21 = vpack.c.bf16 %v344_v13, %v343_v11  ;;  %v535_v22 = vpack.c.bf16 %v352_v14, %v351_v12 }
 0x103   :  { %v510_v23 = vpack.c.bf16 %v342_v19, %v341_v17  ;;  %v530_v24 = vpack.c.bf16 %v350_v20, %v349_v18 }
 0x104   :  { %539 = vst [vmem:[#allocation2 + $0x18] sm:$0xff] %v515_v21   ;;  %543 = vst [vmem:[#allocation2 + $0x38] sm:$0xff] %v535_v22  }
 0x105   :  { %538 = vst [vmem:[#allocation2 + $0x10] sm:$0xff] %v510_v23   ;;  %542 = vst [vmem:[#allocation2 + $0x30] sm:$0xff] %v530_v24  }
 0x106   :  { %641 = shalt.err (!%p638_p4)
}
 0x107   :  { %s642_s23 = scalar_lea.hbm %s789_s3, 1024 }
 0x108   :  { %p643_p5 = scmp.ne.s32.totalorder %s789_s3, %s642_s23  ;;  %p646_p6 = scmp.lt.u32.totalorder %s642_s23, %s789_s3 }
 0x10a   :  { %p648_p7 = pnand %p646_p6, %p643_p5 }
 0x10c   :  { %651 = shalt.err (!%p648_p7)
}
 0x10d   :  { %s656_s28 = smov 64   ;;  %s657_s29 = smov 4  }
 0x10e   :  { %444 = dma.vmem_to_hbm [thread:$0]  %s439_s2, 1024, %s789_s3, [#allocation3], %s656_s28, %s656_s28, %s657_s29  }
 0x10f   :  { %652 = dma.done.wait [#allocation3], 1024  }
 0x110   :  { %653 = vsyncadd [#allocation3], 4294966272 }
 0x111   :  { %448 = vsyncpa [#allocation3], 1 }

</bundles_post_ra>
